<compile_context>
chip_gen: v6e
topology: v6e:2x2x1
jax: 0.10.0
libtpu: 0.0.40
codegen_flags: <defaults>
</compile_context>

<pallas_src>
import functools

import jax
import jax.numpy as jnp
from jax import lax
from jax.experimental import pallas as pl
from jax.experimental.pallas import tpu as pltpu


def _pick_block(n, requested, prefs, max_tile=None):
    """Largest preferred tile (<= max_tile) dividing n.  n is a multiple of 128."""
    cap = n if max_tile is None else min(n, max_tile)
    if requested is not None and requested <= cap and n % requested == 0:
        return int(requested)
    for t in prefs:
        if t <= cap and n % t == 0:
            return int(t)
    return 128


# ----------------------------- kernel 1: projection --------------------------
def gat_project_kernel(x_ref, w_ref, h_ref, s_ref, *, f_pad, ones_col):
    x = x_ref[...]                                                     # (tp, f_in) bf16
    # Fused weight [W_pad | W@a1, W@a2]: one MXU pass per tile yields hidden
    # and both folded attention scores (lane-dense, no width-1 matmuls).
    full = jnp.dot(x, w_ref[...], preferred_element_type=jnp.float32)  # (tp, f_pad+128)
    h = full[:, :f_pad]
    if ones_col >= 0:
        # Spare padded lane set to 1.0 so kernel 2's p @ hidden matmul also
        # produces the softmax denominator (row-sum of p) for free.
        col = lax.broadcasted_iota(jnp.int32, h.shape, 1)
        h = jnp.where(col == ones_col, jnp.float32(1.0), h)
    h_ref[...] = h.astype(jnp.bfloat16)
    s_ref[...] = full[:, f_pad:]


# -------------------- kernel 2: tiled masked softmax + aggregate -------------
def gat_attn_kernel(*refs, alpha, activation, ones_col, has_adj,
                    n_valid, n_total, block_k):
    if has_adj:
        s1_ref, s2_ref, adj_ref, hkv_ref, out_ref, *scratch = refs
    else:
        s1_ref, s2_ref, hkv_ref, out_ref, *scratch = refs
        adj_ref = None
    if ones_col >= 0:
        m_sc, acc_sc = scratch
        l_sc = None
    else:
        m_sc, acc_sc, l_sc = scratch

    j = pl.program_id(1)

    @pl.when(j == 0)
    def _():
        m_sc[...] = jnp.full_like(m_sc, -jnp.inf)
        acc_sc[...] = jnp.zeros_like(acc_sc)
        if ones_col < 0:
            l_sc[...] = jnp.zeros_like(l_sc)

    # e[i, k] = leakyrelu(s1[i] + s2[k]);  s2 arrives as a (1, tk) lane row.
    # TODO(synk): on v6e/v7x this score pipeline could run in bf16 (bf16
    # VALU/EUP) for ~2x VPU throughput; kept f32 here for accuracy.
    e = s1_ref[...] + s2_ref[...]                          # (tq, tk) f32
    e = jnp.where(e > 0, e, alpha * e)                     # LeakyReLU(alpha)
    if has_adj:
        # Direct compare on the streamed adjacency (no dtype unpack, 1 select).
        e = jnp.where(adj_ref[...] > 0, e, jnp.float32(-9e15))
    elif n_valid < n_total:
        # No adjacency given but N was padded: mask the padded key columns.
        col = j * block_k + lax.broadcasted_iota(jnp.int32, e.shape, 1)
        e = jnp.where(col < n_valid, e, jnp.float32(-9e15))

    # Online (flash-style) softmax update.
    m_prev = m_sc[...]
    m_new = jnp.maximum(m_prev, jnp.max(e, axis=1, keepdims=True))
    corr = jnp.exp(m_prev - m_new)
    p = jnp.exp(e - m_new)
    if ones_col < 0:
        l_sc[...] = corr * l_sc[...] + jnp.sum(p, axis=1, keepdims=True)
    # The ones column of hkv makes column `ones_col` of acc the running
    # row-sum of p (same corr recurrence -> exact), so no XLU reduce needed.
    acc_sc[...] = corr * acc_sc[...] + jnp.dot(
        p.astype(jnp.bfloat16), hkv_ref[...], preferred_element_type=jnp.float32)
    m_sc[...] = m_new

    # TODO(synk): F.dropout(attention, p, training=self.training) is a no-op
    # in eval mode; training-mode dropout is not implemented here.

    @pl.when(j == pl.num_programs(1) - 1)
    def _():
        acc = acc_sc[...]
        if ones_col >= 0:
            l = acc[:, ones_col:ones_col + 1]      # sum(p) via MXU ones column
        else:
            l = l_sc[...]
        h = acc * pl.reciprocal(l, approx=True)
        if activation:
            # ELU, inf-free formulation (exp only sees the clamped-negative arg).
            h = jnp.where(h > 0, h, jnp.exp(jnp.minimum(h, 0.0)) - 1.0)
        out_ref[...] = h


# --------------------------------- wrapper -----------------------------------
def gat_forward(x, w, a_vec, adj=None, *, alpha, activation=True,
                block_q=None, block_kv=None):
    """x: (N, F_in), w: (F_in, F_out) (pre-transposed nn.Linear weight),
    a_vec: (2*F_out,) (adj_func weight row), adj: (N, N) or None."""
    n, f_in = x.shape
    f_out = w.shape[1]
    f_pad = ((f_out + 127) // 128) * 128          # lane-dense padded width
    ones_col = f_out if f_out < f_pad else -1     # spare lane for MXU row-sum
    n_pad = ((n + 127) // 128) * 128              # pad N so tiles always divide

    w32 = w.astype(jnp.float32)
    a1 = a_vec[:f_out].astype(jnp.float32)
    a2 = a_vec[f_out:].astype(jnp.float32)

    # Fused weight: [ W (padded to f_pad) | W@a1, W@a2 (padded to 128) ].
    w_pad = jnp.pad(w32, ((0, 0), (0, f_pad - f_out)))
    wa = jnp.pad(jnp.stack([w32 @ a1, w32 @ a2], axis=1), ((0, 0), (0, 126)))
    w_all = jnp.concatenate([w_pad, wa], axis=1).astype(jnp.bfloat16)

    x_bf = x.astype(jnp.bfloat16)
    if n_pad != n:
        x_bf = jnp.pad(x_bf, ((0, n_pad - n), (0, 0)))

    # --- kernel 1: fused projection + folded attention scores ----------------
    tp = _pick_block(n_pad, None, (512, 256, 128))
    proj = functools.partial(gat_project_kernel, f_pad=f_pad, ones_col=ones_col)
    hidden, s_cols = pl.pallas_call(
        proj,
        out_shape=(jax.ShapeDtypeStruct((n_pad, f_pad), jnp.bfloat16),
                   jax.ShapeDtypeStruct((n_pad, 128), jnp.float32)),
        grid=(n_pad // tp,),
        in_specs=[pl.BlockSpec((tp, f_in), lambda i: (i, 0)),
                  pl.BlockSpec((f_in, f_pad + 128), lambda i: (0, 0))],
        out_specs=(pl.BlockSpec((tp, f_pad), lambda i: (i, 0)),
                   pl.BlockSpec((tp, 128), lambda i: (i, 0))),
        compiler_params=pltpu.CompilerParams(
            dimension_semantics=("parallel",)),
    )(x_bf, w_all)

    s1 = s_cols[:, 0:1]                          # (n_pad, 1) query-side scores
    s2_row = s_cols[:, 1].reshape(1, n_pad)      # (1, n_pad) key-side, lane row

    # tq capped to keep >= 2 query tiles (both v7x cores busy via "parallel").
    tq = _pick_block(n_pad, block_q, (512, 256, 128),
                     max_tile=max(n_pad // 2, 128))
    tk = _pick_block(n_pad, block_kv, (512, 256, 128))

    has_adj = adj is not None
    inputs = [s1, s2_row]
    in_specs = [pl.BlockSpec((tq, 1), lambda i, j: (i, 0)),      # s1
                pl.BlockSpec((1, tk), lambda i, j: (0, j))]      # s2 (lane row)
    if has_adj:
        adj_in = adj
        if n_pad != n:
            adj_in = jnp.pad(adj_in, ((0, n_pad - n), (0, n_pad - n)))
        inputs.append(adj_in)                    # streamed as-is, no pre-pass
        in_specs.append(pl.BlockSpec((tq, tk), lambda i, j: (i, j)))
    inputs.append(hidden)
    in_specs.append(pl.BlockSpec((tk, f_pad), lambda i, j: (j, 0)))

    scratch = [pltpu.VMEM((tq, 1), jnp.float32),        # m
               pltpu.VMEM((tq, f_pad), jnp.float32)]    # acc (incl. l column)
    if ones_col < 0:
        scratch.append(pltpu.VMEM((tq, 1), jnp.float32))  # l fallback

    kernel = functools.partial(
        gat_attn_kernel, alpha=float(alpha), activation=activation,
        ones_col=ones_col, has_adj=has_adj, n_valid=n, n_total=n_pad,
        block_k=tk)

    out_pad = pl.pallas_call(
        kernel,
        out_shape=jax.ShapeDtypeStruct((n_pad, f_pad), jnp.float32),
        grid=(n_pad // tq, n_pad // tk),
        in_specs=in_specs,
        out_specs=pl.BlockSpec((tq, f_pad), lambda i, j: (i, 0)),
        scratch_shapes=scratch,
        compiler_params=pltpu.CompilerParams(
            dimension_semantics=("parallel", "arbitrary"),
            vmem_limit_bytes=32 * 1024 * 1024),
    )(*inputs)

    return out_pad[:n, :f_out]


# ------------------------------ pure-JAX reference ---------------------------
def gat_reference(x, w, a_vec, adj, *, alpha):
    hidden = x @ w
    f_out = w.shape[1]
    a1 = a_vec[:f_out]
    a2 = a_vec[f_out:]
    e = (hidden @ a1)[:, None] + (hidden @ a2)[None, :]
    e = jnp.where(e > 0, e, alpha * e)
    att = jnp.where(adj > 0, e, -9e15)
    att = jax.nn.softmax(att, axis=1)
    h_prime = att @ hidden
    return jnp.where(h_prime > 0, h_prime, jnp.exp(jnp.minimum(h_prime, 0.0)) - 1.0)


if __name__ == "__main__":
    N = 256            # number of graph nodes (exercises a 2x1 attention grid)
    F_IN = 16          # in_features
    F_OUT = 32         # out_features
    ALPHA = 0.2        # LeakyReLU negative slope
    # dropout prob irrelevant in eval mode

    key = jax.random.PRNGKey(0)
    kx, kw, ka, kadj = jax.random.split(key, 4)

    # Deterministic "c2_xavier_fill"-style init (uniform over fan_in bound).
    x = jax.random.normal(kx, (N, F_IN), dtype=jnp.float32)
    w_bound = (6.0 / F_IN) ** 0.5
    w = jax.random.uniform(kw, (F_IN, F_OUT), jnp.float32, -w_bound, w_bound)
    a_bound = (6.0 / (2 * F_OUT)) ** 0.5
    a_vec = jax.random.uniform(ka, (2 * F_OUT,), jnp.float32, -a_bound, a_bound)
    adj = (jax.random.uniform(kadj, (N, N)) > 0.6).astype(jnp.float32)
    adj = adj + jnp.eye(N, dtype=jnp.float32)   # self-loops so no empty rows

    out = gat_forward(x, w, a_vec, adj, alpha=ALPHA)
    out = jax.block_until_ready(out)
    ref = gat_reference(x, w, a_vec, adj, alpha=ALPHA)
    assert out.shape == (N, F_OUT)
    # bf16 MXU inputs + approx reciprocal => loosened tolerance vs f32 reference.
    assert jnp.allclose(out, ref, atol=5e-2, rtol=5e-2), (
        f"mismatch vs reference, max abs err = {jnp.max(jnp.abs(out - ref))}")

    # Second check: N not a multiple of 128 -> exercises the pad-to-128 path.
    N2 = 200
    x2 = x[:N2]
    adj2 = adj[:N2, :N2]
    out2 = jax.block_until_ready(
        gat_forward(x2, w, a_vec, adj2, alpha=ALPHA))
    ref2 = gat_reference(x2, w, a_vec, adj2, alpha=ALPHA)
    assert out2.shape == (N2, F_OUT)
    assert jnp.allclose(out2, ref2, atol=5e-2, rtol=5e-2), (
        f"padded-N mismatch, max abs err = {jnp.max(jnp.abs(out2 - ref2))}")

    print("KERNEL_OK")
</pallas_src>

<mosaic_0001>
module attributes {stable_mosaic.version = 11 : i64} {
  func.func @gat_project_kernel(%arg0: i32, %arg1: memref<256x16xbf16, #tpu.memory_space<vmem>>, %arg2: memref<16x256xbf16, #tpu.memory_space<vmem>>, %arg3: memref<256x128xbf16, #tpu.memory_space<vmem>>, %arg4: memref<256x128xf32, #tpu.memory_space<vmem>>) attributes {dimension_semantics = [#tpu.dimension_semantics<parallel>], iteration_bounds = array<i64: 1>, scalar_prefetch = 0 : i64, scratch_operands = 0 : i64, tpu.core_type = #tpu.core_type<tc>, window_params = [{transform_indices = @transform_0, window_bounds = array<i64: 256, 16>}, {pipeline_mode = #tpu.pipeline_mode<synchronous>, transform_indices = @transform_1, window_bounds = array<i64: 16, 256>}, {transform_indices = @transform_2, window_bounds = array<i64: 256, 128>}, {transform_indices = @transform_3, window_bounds = array<i64: 256, 128>}]} {
    %c0 = arith.constant 0 : index
    %c0_0 = arith.constant 0 : index
    %0 = vector.load %arg1[%c0, %c0_0] : memref<256x16xbf16, #tpu.memory_space<vmem>>, vector<256x16xbf16>
    %c0_1 = arith.constant 0 : index
    %c0_2 = arith.constant 0 : index
    %1 = vector.load %arg2[%c0_1, %c0_2] : memref<16x256xbf16, #tpu.memory_space<vmem>>, vector<16x256xbf16>
    %cst = arith.constant dense<0.000000e+00> : vector<256x256xf32>
    %2 = tpu.matmul %0, %1, %cst {dimension_numbers = #tpu.dot_dimension_numbers<[1], [0], [0], [1], [0, 0, 1, 1], [], []>} : vector<256x16xbf16>, vector<16x256xbf16>, vector<256x256xf32> -> vector<256x256xf32>
    %3 = vector.extract_strided_slice %2 {offsets = [0, 0], sizes = [256, 128], strides = [1, 1]} : vector<256x256xf32> to vector<256x128xf32>
    %4 = tpu.iota {dimensions = array<i32: 1>} : vector<256x128xi32>
    %c32_i32 = arith.constant 32 : i32
    %5 = vector.broadcast %c32_i32 : i32 to vector<256x128xi32>
    %6 = arith.cmpi eq, %4, %5 : vector<256x128xi32>
    %cst_3 = arith.constant 1.000000e+00 : f32
    %7 = vector.broadcast %cst_3 : f32 to vector<256x128xf32>
    %8 = arith.select %6, %7, %3 : vector<256x128xi1>, vector<256x128xf32>
    %9 = arith.truncf %8 : vector<256x128xf32> to vector<256x128xbf16>
    %c0_4 = arith.constant 0 : index
    %c0_5 = arith.constant 0 : index
    %10 = vector.load %arg3[%c0_4, %c0_5] : memref<256x128xbf16, #tpu.memory_space<vmem>>, vector<256x128xbf16>
    tpu.vector_store %arg3[%c0_4, %c0_5], %9 {strides = array<i32>} : memref<256x128xbf16, #tpu.memory_space<vmem>>, vector<256x128xbf16>,
    %11 = vector.extract_strided_slice %2 {offsets = [0, 128], sizes = [256, 128], strides = [1, 1]} : vector<256x256xf32> to vector<256x128xf32>
    %c0_6 = arith.constant 0 : index
    %c0_7 = arith.constant 0 : index
    %12 = vector.load %arg4[%c0_6, %c0_7] : memref<256x128xf32, #tpu.memory_space<vmem>>, vector<256x128xf32>
    tpu.vector_store %arg4[%c0_6, %c0_7], %11 {strides = array<i32>} : memref<256x128xf32, #tpu.memory_space<vmem>>, vector<256x128xf32>,
    return
  }
  func.func @transform_0(%arg0: i32) -> (i32, i32) {
    %c0_i32 = arith.constant 0 : i32
    %c0_i32_0 = arith.constant 0 : i32
    return %arg0, %c0_i32 : i32, i32
  }
  func.func @transform_1(%arg0: i32) -> (i32, i32) {
    %c0_i32 = arith.constant 0 : i32
    %c0_i32_0 = arith.constant 0 : i32
    %c0_i32_1 = arith.constant 0 : i32
    return %c0_i32, %c0_i32_0 : i32, i32
  }
  func.func @transform_2(%arg0: i32) -> (i32, i32) {
    %c0_i32 = arith.constant 0 : i32
    %c0_i32_0 = arith.constant 0 : i32
    return %arg0, %c0_i32 : i32, i32
  }
  func.func @transform_3(%arg0: i32) -> (i32, i32) {
    %c0_i32 = arith.constant 0 : i32
    %c0_i32_0 = arith.constant 0 : i32
    return %arg0, %c0_i32 : i32, i32
  }
}

</mosaic_0001>

<bundles_post_ra>
// kernel: tpu_custom_call.1
= control target key start
LH: loop header
LB: loop body
LE: loop exit
PB: predicated region body
PF: predicated region fallthrough
CT: control target
= control target key end

     0   :  { %9 = vsyncpa [#allocation3], 0  ;;  %v906_v2 = vmov 0   ;;  %vm140_vm0 = vcmask 130048   ;;  %s1083_s0 = inlined_call_operand.vmem [shape: bf16[256,16], index: 0, kind: input, shape index: {}]   ;;  %s1084_s1 = inlined_call_operand.vmem [shape: bf16[16,256], index: 1, kind: input, shape index: {}]   ;;  %s1085_s2 = inlined_call_operand.hbm [shape: bf16[256,128], index: 2, kind: output, shape index: {0}]   ;;  %s1086_s3 = inlined_call_operand.hbm [shape: f32[256,128], index: 3, kind: output, shape index: {1}]  }
   0x1   :  { %v843_v0 = vld [vmem:[%s1084_s1 + $0x4] ss:$8 sps:$4 sm:$0xff]   ;;  %v845_v1 = vld [vmem:[%s1084_s1] ss:$8 sps:$4 sm:$0xff]   ;;  %221 = vmatprep.mubr.bf16.mxu0 %v906_v2  ;;  %301 = vmatprep.mubr.bf16.mxu1 %v906_v2 }
   0x2   :  { %203 = vmatprep.subr.bf16.mxu0 %v843_v0  ;;  %834 = vmatprep.subr.bf16.mxu1 %v843_v0  ;;  %v846_v3 = vld [vmem:[%s1083_s0] sm:$0xff]   ;;  %v848_v5 = vld [vmem:[%s1083_s0 + $0x8] sm:$0xff]  }
   0x3   :  { %204 = vmatpush1.bf16.msra.mxu0 %v845_v1  ;;  %835 = vmatpush1.bf16.msra.mxu1 %v845_v1  ;;  %v847_v4 = vld [vmem:[%s1083_s0 + $0x40] sm:$0xff]   ;;  %v849_v6 = vld [vmem:[%s1083_s0 + $0x48] sm:$0xff]  }
   0x6   :  { %659 = vmatmul.mubr.msk.bf16.vlgmr.msra.gmra.mxu0 %vm140_vm0, %v846_v3  ;;  %667 = vmatmul.mubr.msk.bf16.vlgmr.msra.gmra.mxu1 %vm140_vm0, %v847_v4 }
   0x7   :  { %231 = vmatprep.mubr.bf16.mxu0 %v906_v2  ;;  %311 = vmatprep.mubr.bf16.mxu1 %v906_v2 }
   0xe   :  { %660 = vmatmul.mubr.msk.bf16.gmra.mxu0 %vm140_vm0, %v848_v5  ;;  %668 = vmatmul.mubr.msk.bf16.gmra.mxu1 %vm140_vm0, %v849_v6 }
   0xf   :  { %241 = vmatprep.mubr.bf16.mxu0 %v906_v2  ;;  %321 = vmatprep.mubr.bf16.mxu1 %v906_v2 }
  0x10   :  { %10 = vsyncpa [#allocation5], 0  ;;  %v850_v7 = vld [vmem:[%s1083_s0 + $0x10] sm:$0xff]   ;;  %v852_v9 = vld [vmem:[%s1083_s0 + $0x18] sm:$0xff]   ;;  %v382_v19 = vlaneseq  ;;  %s908_s20 = smov [#allocation4]  }
  0x11   :  { %v851_v8 = vld [vmem:[%s1083_s0 + $0x50] sm:$0xff]   ;;  %v853_v10 = vld [vmem:[%s1083_s0 + $0x58] sm:$0xff]   ;;  %v854_v11 = vld [vmem:[%s1083_s0 + $0x20] sm:$0xff]   ;;  %s626_s21 = sshll.u32 %s908_s20, 4  ;;  %s627_s21 = int_to_ptr.vmem [resolvable:$true] %s626_s21 }
  0x12   :  { %v855_v12 = vld [vmem:[%s1083_s0 + $0x60] sm:$0xff]   ;;  %v856_v13 = vld [vmem:[%s1083_s0 + $0x28] sm:$0xff]   ;;  %v858_v15 = vld [vmem:[%s1083_s0 + $0x30] sm:$0xff]   ;;  %v1003_v20 = vand.u32 127, %v382_v19  ;;  %s862_s22 = scalar_lea.vmem %s627_s21, 4096  ;;  %p867_p1 = scmp.lt.s32.totalorder %s627_s21, %s627_s21 }
  0x13   :  { %v857_v14 = vld [vmem:[%s1083_s0 + $0x68] sm:$0xff]   ;;  %v859_v16 = vld [vmem:[%s1083_s0 + $0x70] sm:$0xff]   ;;  %v860_v17 = vld [vmem:[%s1083_s0 + $0x38] sm:$0xff]   ;;  %p863_p0 = scmp.ne.s32.totalorder %s627_s21, %s862_s22  ;;  %p868_p2 = scmp.lt.s32.totalorder %s862_s22, %s862_s22 }
  0x14   :  { %v861_v18 = vld [vmem:[%s1083_s0 + $0x78] sm:$0xff]   ;;  %vm384_vm1 = vcmp.eq.s32.totalorder %v1003_v20, 32  ;;  %s907_s0 = smov [#allocation2]  }
  0x15   :  { %s614_s1 = sshll.u32 %s907_s0, 4  ;;  %p869_p3 = por %p868_p2, %p867_p1  ;;  %s1062_s1 = int_to_ptr.vmem [resolvable:$true] %s614_s1 }
  0x16   :  { %661 = vmatmul.mubr.msk.bf16.gmra.mxu0 %vm140_vm0, %v850_v7  ;;  %669 = vmatmul.mubr.msk.bf16.gmra.mxu1 %vm140_vm0, %v851_v8 }
  0x17   :  { %251 = vmatprep.mubr.bf16.mxu0 %v906_v2  ;;  %331 = vmatprep.mubr.bf16.mxu1 %v906_v2  ;;  %p870_p4 = pnand %p869_p3, %p863_p0 }
  0x1e   :  { %662 = vmatmul.mubr.msk.bf16.gmra.mxu0 %vm140_vm0, %v852_v9  ;;  %670 = vmatmul.mubr.msk.bf16.gmra.mxu1 %vm140_vm0, %v853_v10 }
  0x1f   :  { %261 = vmatprep.mubr.bf16.mxu0 %v906_v2  ;;  %341 = vmatprep.mubr.bf16.mxu1 %v906_v2 }
  0x26   :  { %663 = vmatmul.mubr.msk.bf16.gmra.mxu0 %vm140_vm0, %v854_v11  ;;  %671 = vmatmul.mubr.msk.bf16.gmra.mxu1 %vm140_vm0, %v855_v12 }
  0x27   :  { %271 = vmatprep.mubr.bf16.mxu0 %v906_v2  ;;  %351 = vmatprep.mubr.bf16.mxu1 %v906_v2 }
  0x2e   :  { %664 = vmatmul.mubr.msk.bf16.gmra.mxu0 %vm140_vm0, %v856_v13  ;;  %672 = vmatmul.mubr.msk.bf16.gmra.mxu1 %vm140_vm0, %v857_v14 }
  0x2f   :  { %281 = vmatprep.mubr.bf16.mxu0 %v906_v2  ;;  %361 = vmatprep.mubr.bf16.mxu1 %v906_v2 }
  0x36   :  { %665 = vmatmul.mubr.msk.bf16.gmra.mxu0 %vm140_vm0, %v858_v15  ;;  %673 = vmatmul.mubr.msk.bf16.gmra.mxu1 %vm140_vm0, %v859_v16 }
  0x37   :  { %291 = vmatprep.mubr.bf16.mxu0 %v906_v2  ;;  %371 = vmatprep.mubr.bf16.mxu1 %v906_v2 }
  0x3e   :  { %666 = vmatmul.mubr.msk.bf16.gmra.mxu0 %vm140_vm0, %v860_v17  ;;  %674 = vmatmul.mubr.msk.bf16.gmra.mxu1 %vm140_vm0, %v861_v18 }
  0xc6   :  { %v223_v21 = vpop.f32.mrf.mxu0  ;;  %v303_v22 = vpop.f32.mrf.mxu1 }
  0xc7   :  { %v385_v27 = vsel %vm384_vm1, 1.0, %v223_v21  ;;  %v401_v28 = vsel %vm384_vm1, 1.0, %v303_v22 }
  0xc8   :  { %v225_v23 = vpop.f32.mrf.mxu0  ;;  %v305_v24 = vpop.f32.mrf.mxu1 }
  0xc9   :  { %577 = vst [vmem:[#allocation4] sm:$0xff] %v225_v23  ;;  %593 = vst [vmem:[#allocation4 + $0x80] sm:$0xff] %v305_v24 }
  0xca   :  { %v227_v25 = vpop.f32.mrf.mxu0  ;;  %v307_v26 = vpop.f32.mrf.mxu1 }
  0xcb   :  { %v386_v29 = vsel %vm384_vm1, 1.0, %v227_v25  ;;  %v402_v30 = vsel %vm384_vm1, 1.0, %v307_v26 }
  0xcc   :  { %v742_v31 = vpack.c.bf16 %v386_v29, %v385_v27  ;;  %v782_v32 = vpack.c.bf16 %v402_v30, %v401_v28  ;;  %v229_v33 = vpop.f32.mrf.mxu0  ;;  %v309_v34 = vpop.f32.mrf.mxu1 }
  0xcd   :  { %578 = vst [vmem:[#allocation4 + $0x8] sm:$0xff] %v229_v33  ;;  %594 = vst [vmem:[#allocation4 + $0x88] sm:$0xff] %v309_v34 }
  0xce   :  { %743 = vst [vmem:[#allocation2] sm:$0xff] %v742_v31   ;;  %826 = vst [vmem:[#allocation2 + $0x40] sm:$0xff] %v782_v32   ;;  %v233_v35 = vpop.f32.mrf.mxu0  ;;  %v313_v36 = vpop.f32.mrf.mxu1 }
  0xcf   :  { %v387_v41 = vsel %vm384_vm1, 1.0, %v233_v35  ;;  %v403_v42 = vsel %vm384_vm1, 1.0, %v313_v36 }
  0xd0   :  { %v235_v37 = vpop.f32.mrf.mxu0  ;;  %v315_v38 = vpop.f32.mrf.mxu1 }
  0xd1   :  { %579 = vst [vmem:[#allocation4 + $0x10] sm:$0xff] %v235_v37  ;;  %595 = vst [vmem:[#allocation4 + $0x90] sm:$0xff] %v315_v38 }
  0xd2   :  { %v237_v39 = vpop.f32.mrf.mxu0  ;;  %v317_v40 = vpop.f32.mrf.mxu1 }
  0xd3   :  { %v388_v43 = vsel %vm384_vm1, 1.0, %v237_v39  ;;  %v404_v44 = vsel %vm384_vm1, 1.0, %v317_v40 }
  0xd4   :  { %v747_v45 = vpack.c.bf16 %v388_v43, %v387_v41  ;;  %v787_v46 = vpack.c.bf16 %v404_v44, %v403_v42  ;;  %v239_v47 = vpop.f32.mrf.mxu0  ;;  %v319_v48 = vpop.f32.mrf.mxu1 }
  0xd5   :  { %580 = vst [vmem:[#allocation4 + $0x18] sm:$0xff] %v239_v47  ;;  %596 = vst [vmem:[#allocation4 + $0x98] sm:$0xff] %v319_v48 }
  0xd6   :  { %819 = vst [vmem:[#allocation2 + $0x8] sm:$0xff] %v747_v45   ;;  %827 = vst [vmem:[#allocation2 + $0x48] sm:$0xff] %v787_v46   ;;  %v243_v49 = vpop.f32.mrf.mxu0  ;;  %v323_v50 = vpop.f32.mrf.mxu1 }
  0xd7   :  { %v389_v55 = vsel %vm384_vm1, 1.0, %v243_v49  ;;  %v405_v56 = vsel %vm384_vm1, 1.0, %v323_v50 }
  0xd8   :  { %v245_v51 = vpop.f32.mrf.mxu0  ;;  %v325_v52 = vpop.f32.mrf.mxu1 }
  0xd9   :  { %581 = vst [vmem:[#allocation4 + $0x20] sm:$0xff] %v245_v51  ;;  %597 = vst [vmem:[#allocation4 + $0xa0] sm:$0xff] %v325_v52 }
  0xda   :  { %v247_v53 = vpop.f32.mrf.mxu0  ;;  %v327_v54 = vpop.f32.mrf.mxu1 }
  0xdb   :  { %v390_v57 = vsel %vm384_vm1, 1.0, %v247_v53  ;;  %v406_v58 = vsel %vm384_vm1, 1.0, %v327_v54 }
  0xdc   :  { %v752_v59 = vpack.c.bf16 %v390_v57, %v389_v55  ;;  %v792_v60 = vpack.c.bf16 %v406_v58, %v405_v56  ;;  %v249_v61 = vpop.f32.mrf.mxu0  ;;  %v329_v62 = vpop.f32.mrf.mxu1 }
  0xdd   :  { %582 = vst [vmem:[#allocation4 + $0x28] sm:$0xff] %v249_v61  ;;  %598 = vst [vmem:[#allocation4 + $0xa8] sm:$0xff] %v329_v62 }
  0xde   :  { %820 = vst [vmem:[#allocation2 + $0x10] sm:$0xff] %v752_v59   ;;  %828 = vst [vmem:[#allocation2 + $0x50] sm:$0xff] %v792_v60   ;;  %v253_v63 = vpop.f32.mrf.mxu0  ;;  %v333_v0 = vpop.f32.mrf.mxu1 }
  0xdf   :  { %v391_v5 = vsel %vm384_vm1, 1.0, %v253_v63  ;;  %v407_v6 = vsel %vm384_vm1, 1.0, %v333_v0 }
  0xe0   :  { %v255_v1 = vpop.f32.mrf.mxu0  ;;  %v335_v2 = vpop.f32.mrf.mxu1 }
  0xe1   :  { %583 = vst [vmem:[#allocation4 + $0x30] sm:$0xff] %v255_v1  ;;  %599 = vst [vmem:[#allocation4 + $0xb0] sm:$0xff] %v335_v2 }
  0xe2   :  { %v257_v3 = vpop.f32.mrf.mxu0  ;;  %v337_v4 = vpop.f32.mrf.mxu1 }
  0xe3   :  { %v392_v7 = vsel %vm384_vm1, 1.0, %v257_v3  ;;  %v408_v8 = vsel %vm384_vm1, 1.0, %v337_v4 }
  0xe4   :  { %v757_v9 = vpack.c.bf16 %v392_v7, %v391_v5  ;;  %v797_v10 = vpack.c.bf16 %v408_v8, %v407_v6  ;;  %v259_v11 = vpop.f32.mrf.mxu0  ;;  %v339_v12 = vpop.f32.mrf.mxu1 }
  0xe5   :  { %584 = vst [vmem:[#allocation4 + $0x38] sm:$0xff] %v259_v11  ;;  %600 = vst [vmem:[#allocation4 + $0xb8] sm:$0xff] %v339_v12 }
  0xe6   :  { %821 = vst [vmem:[#allocation2 + $0x18] sm:$0xff] %v757_v9   ;;  %829 = vst [vmem:[#allocation2 + $0x58] sm:$0xff] %v797_v10   ;;  %v263_v13 = vpop.f32.mrf.mxu0  ;;  %v343_v14 = vpop.f32.mrf.mxu1 }
  0xe7   :  { %v393_v19 = vsel %vm384_vm1, 1.0, %v263_v13  ;;  %v409_v21 = vsel %vm384_vm1, 1.0, %v343_v14 }
  0xe8   :  { %v265_v15 = vpop.f32.mrf.mxu0  ;;  %v345_v16 = vpop.f32.mrf.mxu1 }
  0xe9   :  { %585 = vst [vmem:[#allocation4 + $0x40] sm:$0xff] %v265_v15  ;;  %601 = vst [vmem:[#allocation4 + $0xc0] sm:$0xff] %v345_v16 }
  0xea   :  { %v267_v17 = vpop.f32.mrf.mxu0  ;;  %v347_v18 = vpop.f32.mrf.mxu1 }
  0xeb   :  { %v394_v22 = vsel %vm384_vm1, 1.0, %v267_v17  ;;  %v410_v23 = vsel %vm384_vm1, 1.0, %v347_v18 }
  0xec   :  { %v762_v24 = vpack.c.bf16 %v394_v22, %v393_v19  ;;  %v802_v25 = vpack.c.bf16 %v410_v23, %v409_v21  ;;  %v269_v26 = vpop.f32.mrf.mxu0  ;;  %v349_v27 = vpop.f32.mrf.mxu1 }
  0xed   :  { %586 = vst [vmem:[#allocation4 + $0x48] sm:$0xff] %v269_v26  ;;  %602 = vst [vmem:[#allocation4 + $0xc8] sm:$0xff] %v349_v27 }
  0xee   :  { %822 = vst [vmem:[#allocation2 + $0x20] sm:$0xff] %v762_v24   ;;  %830 = vst [vmem:[#allocation2 + $0x60] sm:$0xff] %v802_v25   ;;  %v273_v28 = vpop.f32.mrf.mxu0  ;;  %v353_v29 = vpop.f32.mrf.mxu1 }
  0xef   :  { %v395_v34 = vsel %vm384_vm1, 1.0, %v273_v28  ;;  %v411_v35 = vsel %vm384_vm1, 1.0, %v353_v29 }
  0xf0   :  { %v275_v30 = vpop.f32.mrf.mxu0  ;;  %v355_v31 = vpop.f32.mrf.mxu1 }
  0xf1   :  { %587 = vst [vmem:[#allocation4 + $0x50] sm:$0xff] %v275_v30  ;;  %603 = vst [vmem:[#allocation4 + $0xd0] sm:$0xff] %v355_v31 }
  0xf2   :  { %v277_v32 = vpop.f32.mrf.mxu0  ;;  %v357_v33 = vpop.f32.mrf.mxu1 }
  0xf3   :  { %v396_v36 = vsel %vm384_vm1, 1.0, %v277_v32  ;;  %v412_v37 = vsel %vm384_vm1, 1.0, %v357_v33 }
  0xf4   :  { %v767_v38 = vpack.c.bf16 %v396_v36, %v395_v34  ;;  %v807_v39 = vpack.c.bf16 %v412_v37, %v411_v35  ;;  %v279_v40 = vpop.f32.mrf.mxu0  ;;  %v359_v41 = vpop.f32.mrf.mxu1 }
  0xf5   :  { %588 = vst [vmem:[#allocation4 + $0x58] sm:$0xff] %v279_v40  ;;  %604 = vst [vmem:[#allocation4 + $0xd8] sm:$0xff] %v359_v41 }
  0xf6   :  { %823 = vst [vmem:[#allocation2 + $0x28] sm:$0xff] %v767_v38   ;;  %831 = vst [vmem:[#allocation2 + $0x68] sm:$0xff] %v807_v39   ;;  %v283_v42 = vpop.f32.mrf.mxu0  ;;  %v363_v43 = vpop.f32.mrf.mxu1 }
  0xf7   :  { %v397_v48 = vsel %vm384_vm1, 1.0, %v283_v42  ;;  %v413_v49 = vsel %vm384_vm1, 1.0, %v363_v43 }
  0xf8   :  { %v285_v44 = vpop.f32.mrf.mxu0  ;;  %v365_v45 = vpop.f32.mrf.mxu1 }
  0xf9   :  { %589 = vst [vmem:[#allocation4 + $0x60] sm:$0xff] %v285_v44  ;;  %605 = vst [vmem:[#allocation4 + $0xe0] sm:$0xff] %v365_v45 }
  0xfa   :  { %v287_v46 = vpop.f32.mrf.mxu0  ;;  %v367_v47 = vpop.f32.mrf.mxu1 }
  0xfb   :  { %v398_v50 = vsel %vm384_vm1, 1.0, %v287_v46  ;;  %v414_v51 = vsel %vm384_vm1, 1.0, %v367_v47 }
  0xfc   :  { %v772_v52 = vpack.c.bf16 %v398_v50, %v397_v48  ;;  %v812_v53 = vpack.c.bf16 %v414_v51, %v413_v49  ;;  %v289_v54 = vpop.f32.mrf.mxu0  ;;  %v369_v55 = vpop.f32.mrf.mxu1 }
  0xfd   :  { %590 = vst [vmem:[#allocation4 + $0x68] sm:$0xff] %v289_v54  ;;  %606 = vst [vmem:[#allocation4 + $0xe8] sm:$0xff] %v369_v55 }
  0xfe   :  { %824 = vst [vmem:[#allocation2 + $0x30] sm:$0xff] %v772_v52   ;;  %832 = vst [vmem:[#allocation2 + $0x70] sm:$0xff] %v812_v53   ;;  %v293_v56 = vpop.f32.mrf.mxu0  ;;  %v373_v57 = vpop.f32.mrf.mxu1 }
  0xff   :  { %v399_v62 = vsel %vm384_vm1, 1.0, %v293_v56  ;;  %v415_v63 = vsel %vm384_vm1, 1.0, %v373_v57 }
 0x100   :  { %v295_v58 = vpop.f32.mrf.mxu0  ;;  %v375_v59 = vpop.f32.mrf.mxu1 }
 0x101   :  { %591 = vst [vmem:[#allocation4 + $0x70] sm:$0xff] %v295_v58  ;;  %607 = vst [vmem:[#allocation4 + $0xf0] sm:$0xff] %v375_v59 }
 0x102   :  { %v297_v60 = vpop.f32.mrf.mxu0  ;;  %v377_v61 = vpop.f32.mrf.mxu1 }
 0x103   :  { %v400_v0 = vsel %vm384_vm1, 1.0, %v297_v60  ;;  %v416_v1 = vsel %vm384_vm1, 1.0, %v377_v61 }
 0x104   :  { %v777_v2 = vpack.c.bf16 %v400_v0, %v399_v62  ;;  %v817_v3 = vpack.c.bf16 %v416_v1, %v415_v63  ;;  %v299_v4 = vpop.f32.mrf.mxu0  ;;  %v379_v5 = vpop.f32.mrf.mxu1 }
 0x105   :  { %592 = vst [vmem:[#allocation4 + $0x78] sm:$0xff] %v299_v4  ;;  %608 = vst [vmem:[#allocation4 + $0xf8] sm:$0xff] %v379_v5 }
 0x106   :  { %825 = vst [vmem:[#allocation2 + $0x38] sm:$0xff] %v777_v2   ;;  %833 = vst [vmem:[#allocation2 + $0x78] sm:$0xff] %v817_v3  }
 0x107   :  { %873 = shalt.err (!%p870_p4)
}
 0x108   :  { %s909_s23 = smov 128   ;;  %s910_s24 = smov 8  }
 0x109   :  { %632 = dma.vmem_to_hbm [thread:$0]  %s627_s21, 4096, %s1086_s3, [#allocation5], %s909_s23, %s909_s23, %s910_s24  }
 0x10a   :  { %s882_s27 = scalar_lea.vmem %s1062_s1, 2048  ;;  %p887_p6 = scmp.lt.s32.totalorder %s1062_s1, %s1062_s1 }
 0x10b   :  { %p883_p5 = scmp.ne.s32.totalorder %s1062_s1, %s882_s27  ;;  %p888_p7 = scmp.lt.s32.totalorder %s882_s27, %s882_s27 }
 0x10d   :  { %p889_p8 = por %p888_p7, %p887_p6 }
 0x10f   :  { %p890_p9 = pnand %p889_p8, %p883_p5 }
 0x111   :  { %893 = shalt.err (!%p890_p9)
}
 0x112   :  { %s911_s28 = smov 64   ;;  %s912_s29 = smov 4  }
 0x113   :  { %620 = dma.vmem_to_hbm [thread:$0]  %s1062_s1, 2048, %s1085_s2, [#allocation3], %s911_s28, %s911_s28, %s912_s29  }
 0x114   :  { %902 = dma.done.wait [#allocation3], 2048  }
 0x115   :  { %903 = vsyncadd [#allocation3], 4294965248 }
 0x116   :  { %904 = dma.done.wait [#allocation5], 4096  }
 0x117   :  { %905 = vsyncadd [#allocation5], 4294963200 }
 0x118   :  { %639 = vsyncpa [#allocation3], 1 }
 0x119   :  { %640 = vsyncpa [#allocation5], 1 }

</bundles_post_ra>
